<compile_context>
chip_gen: v5e
topology: v5e:2x2
jax: 0.10.0
libtpu: 0.0.40
codegen_flags: <defaults>
</compile_context>

<pallas_src>
import functools

import jax
import jax.numpy as jnp
from jax.experimental import pallas as pl
from jax.experimental.pallas import tpu as pltpu


def _rmsnorm_kernel(x_ref, w_ref, o_ref, *, eps: float, hidden: int):
    # x_ref: (ROW_TILE, H_pad) input dtype; w_ref: (1, H_pad); o_ref: (ROW_TILE, H_pad)
    x = x_ref[...]
    xf = x.astype(jnp.float32)
    # Sum-of-squares divided by the TRUE hidden size (== mean over the unpadded
    # hidden axis; zero-padded lanes contribute nothing), in float32.
    # Matches torch: data.to(float32).pow(2).mean(-1, keepdim=True)
    v = jnp.sum(xf * xf, axis=-1, keepdims=True) * (1.0 / hidden)
    # data * rsqrt(v + eps): promotes to float32, same as torch.
    rv = xf * jax.lax.rsqrt(v + eps)
    # weight * rv in float32, single cast at the end (matches mlora forward).
    out = w_ref[...].astype(jnp.float32) * rv
    o_ref[...] = out.astype(o_ref.dtype)


def _round_up(n: int, m: int) -> int:
    return ((n + m - 1) // m) * m


def _vmem_budget() -> tuple[int, int]:
    """Generation-aware (block_budget_bytes, vmem_limit_bytes)."""
    try:
        cap = int(pltpu.get_tpu_info().vmem_capacity_bytes)
    except Exception:
        cap = 64 << 20  # conservative fallback (v7x per-TC VMEM)
    # Double-buffered (in + out) blocks ~ 4 * tile_bytes: keep under ~1/4 of
    # physical VMEM, never chasing tiles past the ~512-row roofline plateau.
    block_budget = min(cap // 4, 24 << 20)      # 16 MiB on v7x, 24 MiB on v5e/v6e
    # Scoped-VMEM limit: blocks + ~24 MiB for Mosaic's f32 temporaries, while
    # keeping >=24 MiB of physical headroom on every generation.
    vmem_limit = min(cap - (24 << 20), block_budget + (24 << 20))
    return block_budget, vmem_limit


def _choose_row_tile(rows: int, hidden_pad: int, itemsize: int,
                     block_budget_bytes: int, max_row_tile: int = 512) -> int:
    """Pick a sublane-pack-aligned row tile that fits the block budget."""
    # Sublane packing multiple: 8 for f32, 16 for bf16/f16, 32 for int8/fp8.
    pack = max(8, 32 // max(1, itemsize))
    rt = block_budget_bytes // max(1, 4 * hidden_pad * itemsize)
    rt = max(pack, min(max_row_tile, (rt // pack) * pack))
    # Keep >= 8 grid steps (>= 4 per TensorCore on v7x's 2 TCs) when there is
    # enough work, but never shrink below 256 rows per step for it.
    if rows >= 8 * 256:
        rt = min(rt, max(256, _round_up(pl.cdiv(rows, 8), pack)))
    # No point in a tile taller than the (pack-rounded) row count.
    rt = min(rt, _round_up(rows, pack))
    return rt


def rms_norm(x: jax.Array, weight: jax.Array, eps: float = 1e-6,
             row_tile: int | None = None,
             x_pipeline_buffers: int = 2) -> jax.Array:
    """RMSNorm over the last axis of x, scaled by `weight` (shape (hidden,))."""
    orig_shape = x.shape
    hidden = orig_shape[-1]
    assert weight.shape == (hidden,)

    x2d = x.reshape(-1, hidden)
    rows = x2d.shape[0]
    w2d = weight.reshape(1, hidden)

    # Lane-dense guard: pad hidden to a multiple of 128 lanes so stores are
    # unmasked.  The kernel divides by the true `hidden`, so zero padding does
    # not perturb the mean; padded output lanes are sliced off below.
    hidden_pad = _round_up(hidden, 128)
    if hidden_pad != hidden:
        x2d = jnp.pad(x2d, ((0, 0), (0, hidden_pad - hidden)))
        w2d = jnp.pad(w2d, ((0, 0), (0, hidden_pad - hidden)))

    block_budget, vmem_limit = _vmem_budget()
    if row_tile is None:
        row_tile = _choose_row_tile(rows, hidden_pad, x2d.dtype.itemsize,
                                    block_budget)

    # No row padding / slicing: Pallas masks the ragged last block; per-row
    # math means garbage pad rows are independent and discarded.
    grid = (pl.cdiv(rows, row_tile),)

    x_spec_kwargs = {}
    if x_pipeline_buffers != 2:
        # Optional deeper pipelining (e.g. Buffered(3) on v7x if xprof shows
        # exposed input DMA); default 2 is the standard double buffer.
        x_spec_kwargs["pipeline_mode"] = pl.Buffered(x_pipeline_buffers)

    out = pl.pallas_call(
        functools.partial(_rmsnorm_kernel, eps=eps, hidden=hidden),
        out_shape=jax.ShapeDtypeStruct((rows, hidden_pad), x.dtype),
        grid_spec=pltpu.PrefetchScalarGridSpec(
            num_scalar_prefetch=0,
            grid=grid,
            in_specs=[
                pl.BlockSpec((row_tile, hidden_pad), lambda i: (i, 0),
                             **x_spec_kwargs),
                pl.BlockSpec((1, hidden_pad), lambda i: (0, 0)),
            ],
            out_specs=pl.BlockSpec((row_tile, hidden_pad), lambda i: (i, 0)),
        ),
        compiler_params=pltpu.CompilerParams(
            dimension_semantics=("parallel",),
            vmem_limit_bytes=vmem_limit,
        ),
    )(x2d, w2d)

    if hidden_pad != hidden:
        out = out[:, :hidden]
    return out.reshape(orig_shape)


def _ref_rms_norm(x, weight, eps):
    xf = x.astype(jnp.float32)
    v = jnp.mean(xf * xf, axis=-1, keepdims=True)
    return (weight.astype(jnp.float32) * (xf * jax.lax.rsqrt(v + eps))).astype(x.dtype)


if __name__ == "__main__":
    key = jax.random.PRNGKey(0)
    k_x, k_w, k_x2, k_x3, k_w3 = jax.random.split(key, 5)

    # Small-hidden case (exercises the hidden->128 lane-padding path), bf16.
    batch, seq, hidden = 2, 8, 32
    x = jax.random.normal(k_x, (batch, seq, hidden), dtype=jnp.bfloat16)
    weight = (1.0 + 0.01 * jax.random.normal(k_w, (hidden,))).astype(jnp.bfloat16)

    out = rms_norm(x, weight, eps=1e-6)
    jax.block_until_ready(out)
    ref = _ref_rms_norm(x, weight, 1e-6)
    assert out.shape == x.shape and out.dtype == x.dtype
    assert jnp.allclose(out.astype(jnp.float32), ref.astype(jnp.float32),
                        atol=1e-2, rtol=1e-2)

    # Ragged-grid check: row count not a multiple of the row tile / sublane pack.
    x_ragged = jax.random.normal(k_x2, (3, 5, hidden), dtype=jnp.bfloat16)
    out_ragged = rms_norm(x_ragged, weight, eps=1e-6)
    jax.block_until_ready(out_ragged)
    ref_ragged = _ref_rms_norm(x_ragged, weight, 1e-6)
    assert out_ragged.shape == x_ragged.shape
    assert jnp.allclose(out_ragged.astype(jnp.float32),
                        ref_ragged.astype(jnp.float32), atol=1e-2, rtol=1e-2)
    assert jnp.isfinite(out_ragged.astype(jnp.float32)).all()

    # Lane-aligned f32 case (no padding path, pack=8).
    x3 = jax.random.normal(k_x3, (4, 16, 128), dtype=jnp.float32)
    w3 = 1.0 + 0.01 * jax.random.normal(k_w3, (128,), dtype=jnp.float32)
    out3 = rms_norm(x3, w3, eps=1e-6)
    jax.block_until_ready(out3)
    ref3 = _ref_rms_norm(x3, w3, 1e-6)
    assert out3.shape == x3.shape and out3.dtype == x3.dtype
    assert jnp.allclose(out3, ref3, atol=1e-5, rtol=1e-5)

    print("KERNEL_OK")
</pallas_src>

<mosaic_0001>
module attributes {stable_mosaic.version = 11 : i64} {
  func.func @_rmsnorm_kernel(%arg0: i32, %arg1: memref<16x128xbf16, #tpu.memory_space<vmem>>, %arg2: memref<1x128xbf16, #tpu.memory_space<vmem>>, %arg3: memref<16x128xbf16, #tpu.memory_space<vmem>>) attributes {dimension_semantics = [#tpu.dimension_semantics<parallel>], iteration_bounds = array<i64: 1>, scalar_prefetch = 0 : i64, scratch_operands = 0 : i64, tpu.core_type = #tpu.core_type<tc>, window_params = [{transform_indices = @transform_0, window_bounds = array<i64: 16, 128>}, {pipeline_mode = #tpu.pipeline_mode<synchronous>, transform_indices = @transform_1, window_bounds = array<i64: 1, 128>}, {transform_indices = @transform_2, window_bounds = array<i64: 16, 128>}]} {
    %c0 = arith.constant 0 : index
    %c0_0 = arith.constant 0 : index
    %0 = vector.load %arg1[%c0, %c0_0] : memref<16x128xbf16, #tpu.memory_space<vmem>>, vector<16x128xbf16>
    %1 = arith.extf %0 : vector<16x128xbf16> to vector<16x128xf32>
    %2 = arith.mulf %1, %1 : vector<16x128xf32>
    %cst = arith.constant dense<0.000000e+00> : vector<16xf32>
    %3 = vector.multi_reduction <add>, %2, %cst [1] : vector<16x128xf32> to vector<16xf32>
    %4 = vector.shape_cast %3 : vector<16xf32> to vector<16x1xf32>
    %cst_1 = arith.constant 3.125000e-02 : f32
    %5 = vector.broadcast %cst_1 : f32 to vector<16x1xf32>
    %6 = arith.mulf %4, %5 : vector<16x1xf32>
    %cst_2 = arith.constant 9.99999997E-7 : f32
    %7 = vector.broadcast %cst_2 : f32 to vector<16x1xf32>
    %8 = arith.addf %6, %7 : vector<16x1xf32>
    %9 = math.rsqrt %8 : vector<16x1xf32>
    %10 = vector.broadcast %9 : vector<16x1xf32> to vector<16x128xf32>
    %11 = arith.mulf %1, %10 : vector<16x128xf32>
    %c0_3 = arith.constant 0 : index
    %c0_4 = arith.constant 0 : index
    %12 = vector.load %arg2[%c0_3, %c0_4] : memref<1x128xbf16, #tpu.memory_space<vmem>>, vector<1x128xbf16>
    %13 = arith.extf %12 : vector<1x128xbf16> to vector<1x128xf32>
    %14 = vector.broadcast %13 : vector<1x128xf32> to vector<16x128xf32>
    %15 = arith.mulf %14, %11 : vector<16x128xf32>
    %16 = arith.truncf %15 : vector<16x128xf32> to vector<16x128xbf16>
    %c0_5 = arith.constant 0 : index
    %c0_6 = arith.constant 0 : index
    %17 = vector.load %arg3[%c0_5, %c0_6] : memref<16x128xbf16, #tpu.memory_space<vmem>>, vector<16x128xbf16>
    tpu.vector_store %arg3[%c0_5, %c0_6], %16 {strides = array<i32>} : memref<16x128xbf16, #tpu.memory_space<vmem>>, vector<16x128xbf16>,
    return
  }
  func.func @transform_0(%arg0: i32) -> (i32, i32) {
    %c0_i32 = arith.constant 0 : i32
    %c0_i32_0 = arith.constant 0 : i32
    return %arg0, %c0_i32 : i32, i32
  }
  func.func @transform_1(%arg0: i32) -> (i32, i32) {
    %c0_i32 = arith.constant 0 : i32
    %c0_i32_0 = arith.constant 0 : i32
    %c0_i32_1 = arith.constant 0 : i32
    return %c0_i32, %c0_i32_0 : i32, i32
  }
  func.func @transform_2(%arg0: i32) -> (i32, i32) {
    %c0_i32 = arith.constant 0 : i32
    %c0_i32_0 = arith.constant 0 : i32
    return %arg0, %c0_i32 : i32, i32
  }
}

</mosaic_0001>

<bundles_post_ra>
// kernel: tpu_custom_call.1
= control target key start
LH: loop header
LB: loop body
LE: loop exit
PB: predicated region body
PF: predicated region fallthrough
CT: control target
= control target key end

     0   :  { %7 = vsyncpa [#allocation3], 0  ;;  %s238_s0 = inlined_call_operand.hbm [shape: bf16[16,128], index: 0, kind: input, shape index: {}]   ;;  %s239_s1 = inlined_call_operand.hbm [shape: bf16[1,128], index: 1, kind: input, shape index: {}]   ;;  %s240_s2 = inlined_call_operand.hbm [shape: bf16[16,128], index: 2, kind: output, shape index: {}]  }
   0x1   :  { %8 = vsyncpa [#allocation6], 0 }
   0x2   :  { %9 = vsyncpa [#allocation4], 0  ;;  %s14_s11 = sshll.u32 %s238_s0, 4  ;;  %s203_s12 = smov [#allocation2]   ;;  %s15_s11 = int_to_ptr.hbm [resolvable:$true] %s14_s11 }
   0x3   :  { %s16_s13 = sshll.u32 %s203_s12, 4  ;;  %s28_s16 = sshll.u32 %s239_s1, 4  ;;  %s17_s13 = int_to_ptr.vmem [resolvable:$true] %s16_s13  ;;  %s29_s16 = int_to_ptr.hbm [resolvable:$true] %s28_s16 }
   0x4   :  { %s204_s17 = smov 64   ;;  %s205_s18 = smov 4  }
   0x5   :  { %22 = dma.hbm_to_vmem [thread:$0]  %s15_s11, 128, %s17_s13, [#allocation3], %s204_s17, %s204_s17, %s205_s18  }
   0x6   :  { %s206_s19 = smov [#allocation5]  }
   0x7   :  { %s30_s20 = sshll.u32 %s206_s19, 4  ;;  %s31_s20 = int_to_ptr.vmem [resolvable:$true] %s30_s20 }
   0x8   :  { %33 = dma.hbm_to_vmem [thread:$0]  %s29_s16, 16, %s31_s20, [#allocation6]  }
   0x9   :  { %197 = dma.done.wait [#allocation3], 128  }
   0xa   :  { %198 = vsyncadd [#allocation3], 4294967168 }
   0xb   :  { %199 = dma.done.wait [#allocation6], 16  }
   0xc   :  { %200 = vsyncadd [#allocation6], 4294967280  ;;  %v108_v0 = vld [vmem:[#allocation2] sm:$0xff]   ;;  %v78_v20 = vld [vmem:[#allocation5] sm:$0x1]  ;;  %s207_s0 = smov [#allocation7]  }
   0xd   :  { %v109_v1 = vunpack.c.l.bf16 %v108_v0  ;;  %v110_v3 = vunpack.c.h.bf16 %v108_v0  ;;  %v79_v22 = vunpack.c.l.bf16 %v78_v20  ;;  %s91_s1 = sshll.u32 %s207_s0, 4  ;;  %s93_s23 = sshll.u32 %s240_s2, 4  ;;  %s92_s1 = int_to_ptr.vmem [resolvable:$true] %s91_s1  ;;  %s94_s23 = int_to_ptr.hbm [resolvable:$true] %s93_s23 }
   0xf   :  { %v46_v2 = vmul.f32 %v109_v1, %v109_v1  ;;  %v47_v4 = vmul.f32 %v110_v3, %v110_v3  ;;  %v80_v27 = vperm.slane %v79_v22, 0 }
  0x11   :  { %48 = vadd.xlane.f32.xlu0 %v46_v2 }
  0x19   :  { %50 = vadd.xlane.f32.xlu0 %v47_v4 }
  0x84   :  { %v49_v5 = vpop.xlane.xlu0 %48 }
  0x85   :  { %v52_v6 = vmul.f32 0.03125, %v49_v5 }
  0x87   :  { %v54_v7 = vadd.f32 1e-06, %v52_v6 }
  0x89   :  { %121 = vrsqrt.f32 %v54_v7  ;;  %vm62_vm1 = vweird.f32 %v54_v7 }
  0x8c   :  { %v51_v8 = vpop.xlane.xlu0 %50 }
  0x8d   :  { %v53_v9 = vmul.f32 0.03125, %v51_v8 }
  0x8f   :  { %v122_v10 = vpop.eup %121  ;;  %v55_v11 = vadd.f32 1e-06, %v53_v9 }
  0x90   :  { %v57_v12 = vmul.f32 %v122_v10, %v54_v7  ;;  %vm63_vm0 = vweird.f32 %v122_v10 }
  0x91   :  { %123 = vrsqrt.f32 %v55_v11  ;;  %vm64_vm2 = vmor %vm62_vm1, %vm63_vm0  ;;  %vm72_vm4 = vweird.f32 %v55_v11 }
  0x92   :  { %v58_v13 = vmul.f32 %v122_v10, %v57_v12 }
  0x94   :  { %v59_v14 = vmul.f32 0.5, %v58_v13 }
  0x96   :  { %v60_v15 = vsub.f32 1.5, %v59_v14 }
  0x97   :  { %v124_v16 = vpop.eup %123 }
  0x98   :  { %v67_v17 = vmul.f32 %v124_v16, %v55_v11  ;;  %v61_v18 = vmul.f32 %v122_v10, %v60_v15  ;;  %vm73_vm3 = vweird.f32 %v124_v16 }
  0x99   :  { %vm74_vm5 = vmor %vm72_vm4, %vm73_vm3 }
  0x9a   :  { %v68_v19 = vmul.f32 %v124_v16, %v67_v17  ;;  %v65_v23 = vsel %vm64_vm2, %v122_v10, %v61_v18 }
  0x9b   :  { %v76_v26 = vmul.f32 %v109_v1, %v65_v23 }
  0x9c   :  { %v69_v21 = vmul.f32 0.5, %v68_v19 }
  0x9d   :  { %v81_v30 = vmul.f32 %v80_v27, %v76_v26 }
  0x9e   :  { %v70_v24 = vsub.f32 1.5, %v69_v21 }
  0xa0   :  { %v71_v25 = vmul.f32 %v124_v16, %v70_v24 }
  0xa2   :  { %v75_v28 = vsel %vm74_vm5, %v124_v16, %v71_v25 }
  0xa3   :  { %v77_v29 = vmul.f32 %v110_v3, %v75_v28 }
  0xa5   :  { %v82_v31 = vmul.f32 %v80_v27, %v77_v29 }
  0xa7   :  { %v114_v32 = vpack.c.bf16 %v82_v31, %v81_v30 }
  0xa9   :  { %115 = vst [vmem:[#allocation7] sm:$0xff] %v114_v32  }
  0xaa   :  { %99 = dma.vmem_to_hbm [thread:$0]  %s92_s1, 128, %s94_s23, [#allocation4], %s204_s17, %s204_s17, %s205_s18  }
  0xab   :  { %201 = dma.done.wait [#allocation4], 128  }
  0xac   :  { %202 = vsyncadd [#allocation4], 4294967168 }
  0xad   :  { %104 = vsyncpa [#allocation3], 1 }
  0xae   :  { %105 = vsyncpa [#allocation6], 1 }
  0xaf   :  { %106 = vsyncpa [#allocation4], 1 }

</bundles_post_ra>
